<compile_context>
chip_gen: v7x
topology: tpu7x:2x2x1
jax: 0.10.0
libtpu: 0.0.40
codegen_flags: <defaults>
</compile_context>

<pallas_src>
import math
import functools

import jax
import jax.numpy as jnp
from jax.experimental import pallas as pl
from jax.experimental.pallas import tpu as pltpu


def _round_up(x, m):
    return ((x + m - 1) // m) * m


# ----------------------------------------------------------------------------
# Fast path: majority_size == 3  ->  one tiled MXU matmul, scaled by 1.125.
# ----------------------------------------------------------------------------
def _majfc_mxu_kernel(a_ref, b_ref, o_ref, acc_ref):
    # a_ref: [tb, tk] bf16, b_ref: [tk, tc] bf16, o_ref: [tb, tc] f32
    @pl.when(pl.program_id(2) == 0)
    def _():
        acc_ref[...] = jnp.zeros_like(acc_ref)

    acc_ref[...] += jnp.dot(a_ref[...], b_ref[...],
                            preferred_element_type=jnp.float32)

    @pl.when(pl.program_id(2) == pl.num_programs(2) - 1)
    def _():
        o_ref[...] = (acc_ref[...] * 1.125).astype(o_ref.dtype)


def _majfc3_mxu(x, weight):
    B, c_in = x.shape
    c_out = weight.shape[0]
    g = c_in // 3

    # Binarize once (weights are static parameters -> XLA const-folds under jit)
    xs = jnp.sign(x)                                     # [B, c_in]   (+/-1)
    ws = jnp.sign(weight)                                # [c_out, c_in]
    xg = jnp.prod(xs.reshape(B, g, 3), axis=-1)          # [B, g]
    wg = jnp.prod(ws.reshape(c_out, g, 3), axis=-1)      # [c_out, g]

    # A . Bm^T = xs.ws - xg.wg  (the clamp-of-3 identity), K = c_in + g
    a = jnp.concatenate([xs, -xg], axis=1).astype(jnp.bfloat16)    # [B, K]
    bm = jnp.concatenate([ws, wg], axis=1).astype(jnp.bfloat16)    # [c_out, K]
    k_dim = c_in + g

    # Tile sizes: lane-dense output (multiples of 128 on C_out), sublane-
    # friendly batch tiles, K tiled with an accumulator.  Small enough to fit
    # comfortably in every generation's scoped VMEM (incl. v7x 64 MiB).
    tb = min(256, _round_up(B, 8))
    tc = min(256, _round_up(c_out, 128))
    tk = min(512, _round_up(k_dim, 128))

    bp = _round_up(B, tb)
    cp = _round_up(c_out, tc)
    kp = _round_up(k_dim, tk)

    a = jnp.pad(a, ((0, bp - B), (0, kp - k_dim)))                 # [bp, kp]
    bt = jnp.pad(bm, ((0, cp - c_out), (0, kp - k_dim))).T         # [kp, cp]

    out = pl.pallas_call(
        _majfc_mxu_kernel,
        out_shape=jax.ShapeDtypeStruct((bp, cp), jnp.float32),
        grid_spec=pltpu.PrefetchScalarGridSpec(
            num_scalar_prefetch=0,
            grid=(bp // tb, cp // tc, kp // tk),
            in_specs=[
                pl.BlockSpec((tb, tk), lambda i, j, k: (i, k)),
                pl.BlockSpec((tk, tc), lambda i, j, k: (k, j)),
            ],
            out_specs=pl.BlockSpec((tb, tc), lambda i, j, k: (i, j)),
            scratch_shapes=[pltpu.VMEM((tb, tc), jnp.float32)],
        ),
        compiler_params=pltpu.CompilerParams(
            dimension_semantics=("parallel", "parallel", "arbitrary")),
    )(a, bt)
    return out[:B, :c_out]


# ----------------------------------------------------------------------------
# Generic VPU fallback for other (non-apx) majority sizes.
# Layout [M, rows, G]: group index G on lanes, rows on sublanes, tiny M axis
# leading (no 3->8 sublane padding).  Operands pre-binarized to bf16, upcast
# to f32 in-kernel for compute (v5e VPU has no bf16).
# ----------------------------------------------------------------------------
def _majfc_vpu_kernel(x_ref, w_ref, o_ref, *, majority_size):
    x = x_ref[...].astype(jnp.float32)   # [M, tb, G]
    w = w_ref[...].astype(jnp.float32)   # [M, tc, G]
    tb, tc, g = x.shape[1], w.shape[1], x.shape[2]
    s = jnp.zeros((tb, tc, g), dtype=jnp.float32)
    for k in range(majority_size):       # static unroll, M is tiny
        s = s + x[k][:, None, :] * w[k][None, :, :]
    s = jnp.clip(s, -1.0, 1.0)
    o_ref[...] = (jnp.sum(s, axis=-1) * 2.25).astype(o_ref.dtype)


def _majfc_generic(x, weight, majority_size):
    B, c_in = x.shape
    c_out = weight.shape[0]
    g = c_in // majority_size

    xs = jnp.sign(x).astype(jnp.bfloat16)
    ws = jnp.sign(weight).astype(jnp.bfloat16)
    x3 = xs.reshape(B, g, majority_size).transpose(2, 0, 1)        # [M, B, G]
    w3 = ws.reshape(c_out, g, majority_size).transpose(2, 0, 1)    # [M, C_out, G]

    tb = min(128, _round_up(B, 8))
    tc = min(128, _round_up(c_out, 8))
    bp = _round_up(B, tb)
    cp = _round_up(c_out, tc)

    x3 = jnp.pad(x3, ((0, 0), (0, bp - B), (0, 0)))
    w3 = jnp.pad(w3, ((0, 0), (0, cp - c_out), (0, 0)))

    kernel = functools.partial(_majfc_vpu_kernel, majority_size=majority_size)
    out = pl.pallas_call(
        kernel,
        out_shape=jax.ShapeDtypeStruct((bp, cp), jnp.float32),
        grid_spec=pltpu.PrefetchScalarGridSpec(
            num_scalar_prefetch=0,
            grid=(bp // tb, cp // tc),
            in_specs=[
                pl.BlockSpec((majority_size, tb, g), lambda i, j: (0, i, 0)),
                pl.BlockSpec((majority_size, tc, g), lambda i, j: (0, j, 0)),
            ],
            out_specs=pl.BlockSpec((tb, tc), lambda i, j: (i, j)),
        ),
        compiler_params=pltpu.CompilerParams(
            dimension_semantics=("parallel", "parallel")),
    )(x3, w3)
    return out[:B, :c_out]


# ----------------------------------------------------------------------------
# Public entry point (mirrors MajFC.forward, non-apx).
# ----------------------------------------------------------------------------
def majfc_forward(x, weight, majority_size=3, majority_apx=False):
    """x: [B, C_in] float32, weight: [C_out, C_in] float32 -> [B, C_out] f32."""
    B, c_in = x.shape
    assert c_in % majority_size == 0, "C_in must be divisible by majority_size"
    if majority_apx:
        # TODO(synk): majority_apx (5/7/9) approximation paths not implemented.
        raise NotImplementedError("majority_apx paths not implemented")
    if majority_size == 3:
        return _majfc3_mxu(x, weight)
    return _majfc_generic(x, weight, majority_size)


def majfc_reference(x, weight, majority_size=3):
    """Pure-JAX mirror of the PyTorch forward (non-apx path)."""
    B, c_in = x.shape
    c_out = weight.shape[0]
    g = c_in // majority_size
    xb = jnp.sign(x)
    wb = jnp.sign(weight)
    inter = jnp.einsum('bj,cj->bcj', xb, wb)                   # [B, C_out, C_in]
    s = inter.reshape(B * c_out, g, majority_size).sum(-1)     # [B*C_out, G]
    out = jnp.clip(s, -1.0, 1.0).sum(-1) * 2.25
    return out.reshape(B, c_out)


if __name__ == "__main__":
    # Small shapes consistent with the module: C_in divisible by majority_size.
    B, C_IN, C_OUT, MAJ = 8, 24, 16, 3

    key = jax.random.PRNGKey(0)
    kx, kw = jax.random.split(key)

    # Deterministic parameter init mirroring reset_parameters():
    stdv = 1.0 / math.sqrt(C_OUT * C_IN)
    weight = jax.random.uniform(kw, (C_OUT, C_IN), jnp.float32,
                                minval=-stdv, maxval=stdv)
    x = jax.random.normal(kx, (B, C_IN), jnp.float32)

    out = majfc_forward(x, weight, majority_size=MAJ)
    out = jax.block_until_ready(out)
    ref = majfc_reference(x, weight, majority_size=MAJ)
    assert out.shape == (B, C_OUT)
    assert jnp.allclose(out, ref, atol=1e-4), "maj-3 MXU path mismatch"

    # Also exercise the generic VPU fallback (majority_size=5, non-apx).
    kx5, kw5 = jax.random.split(jax.random.PRNGKey(1))
    w5 = jax.random.uniform(kw5, (16, 40), jnp.float32, minval=-stdv, maxval=stdv)
    x5 = jax.random.normal(kx5, (8, 40), jnp.float32)
    out5 = jax.block_until_ready(majfc_forward(x5, w5, majority_size=5))
    ref5 = majfc_reference(x5, w5, majority_size=5)
    assert jnp.allclose(out5, ref5, atol=1e-4), "generic VPU path mismatch"

    # TODO(synk): weight.org caching / in-place .data mutation is training-time
    # STE bookkeeping with no inference-side effect; not reproduced.
    print("KERNEL_OK")
</pallas_src>

<mosaic_0001>
module attributes {stable_mosaic.version = 11 : i64} {
  func.func @_majfc_mxu_kernel(%arg0: i32, %arg1: i32, %arg2: i32, %arg3: memref<8x128xbf16, #tpu.memory_space<vmem>>, %arg4: memref<128x128xbf16, #tpu.memory_space<vmem>>, %arg5: memref<8x128xf32, #tpu.memory_space<vmem>>, %arg6: memref<8x128xf32, #tpu.memory_space<vmem>>) attributes {dimension_semantics = [#tpu.dimension_semantics<parallel>, #tpu.dimension_semantics<parallel>, #tpu.dimension_semantics<arbitrary>], iteration_bounds = array<i64: 1, 1, 1>, scalar_prefetch = 0 : i64, scratch_operands = 1 : i64, tpu.core_type = #tpu.core_type<tc>, window_params = [{transform_indices = @transform_0, window_bounds = array<i64: 8, 128>}, {transform_indices = @transform_1, window_bounds = array<i64: 128, 128>}, {transform_indices = @transform_2, window_bounds = array<i64: 8, 128>}]} {
    %c0_i32 = arith.constant 0 : i32
    %0 = arith.cmpi eq, %arg2, %c0_i32 : i32
    %1 = arith.extui %0 : i1 to i32
    %c0_i32_0 = arith.constant 0 : i32
    %2 = arith.cmpi ne, %1, %c0_i32_0 : i32
    scf.if %2 {
      %cst_10 = arith.constant 0.000000e+00 : f32
      %12 = vector.broadcast %cst_10 : f32 to vector<8x128xf32>
      %c0_11 = arith.constant 0 : index
      %c0_12 = arith.constant 0 : index
      %13 = vector.load %arg6[%c0_11, %c0_12] : memref<8x128xf32, #tpu.memory_space<vmem>>, vector<8x128xf32>
      tpu.vector_store %arg6[%c0_11, %c0_12], %12 {strides = array<i32>} : memref<8x128xf32, #tpu.memory_space<vmem>>, vector<8x128xf32>,
    } else {
    }
    %c0 = arith.constant 0 : index
    %c0_1 = arith.constant 0 : index
    %3 = vector.load %arg6[%c0, %c0_1] : memref<8x128xf32, #tpu.memory_space<vmem>>, vector<8x128xf32>
    %c0_2 = arith.constant 0 : index
    %c0_3 = arith.constant 0 : index
    %4 = vector.load %arg3[%c0_2, %c0_3] : memref<8x128xbf16, #tpu.memory_space<vmem>>, vector<8x128xbf16>
    %c0_4 = arith.constant 0 : index
    %c0_5 = arith.constant 0 : index
    %5 = vector.load %arg4[%c0_4, %c0_5] : memref<128x128xbf16, #tpu.memory_space<vmem>>, vector<128x128xbf16>
    %cst = arith.constant dense<0.000000e+00> : vector<8x128xf32>
    %6 = tpu.matmul %4, %5, %cst {dimension_numbers = #tpu.dot_dimension_numbers<[1], [0], [0], [1], [0, 0, 1, 1], [], []>} : vector<8x128xbf16>, vector<128x128xbf16>, vector<8x128xf32> -> vector<8x128xf32>
    %7 = arith.addf %3, %6 : vector<8x128xf32>
    %c0_6 = arith.constant 0 : index
    %c0_7 = arith.constant 0 : index
    %8 = vector.load %arg6[%c0_6, %c0_7] : memref<8x128xf32, #tpu.memory_space<vmem>>, vector<8x128xf32>
    tpu.vector_store %arg6[%c0_6, %c0_7], %7 {strides = array<i32>} : memref<8x128xf32, #tpu.memory_space<vmem>>, vector<8x128xf32>,
    %c0_i32_8 = arith.constant 0 : i32
    %9 = arith.cmpi eq, %arg2, %c0_i32_8 : i32
    %10 = arith.extui %9 : i1 to i32
    %c0_i32_9 = arith.constant 0 : i32
    %11 = arith.cmpi ne, %10, %c0_i32_9 : i32
    scf.if %11 {
      %c0_10 = arith.constant 0 : index
      %c0_11 = arith.constant 0 : index
      %12 = vector.load %arg6[%c0_10, %c0_11] : memref<8x128xf32, #tpu.memory_space<vmem>>, vector<8x128xf32>
      %cst_12 = arith.constant 1.125000e+00 : f32
      %13 = vector.broadcast %cst_12 : f32 to vector<8x128xf32>
      %14 = arith.mulf %12, %13 : vector<8x128xf32>
      %c0_13 = arith.constant 0 : index
      %c0_14 = arith.constant 0 : index
      %15 = vector.load %arg5[%c0_13, %c0_14] : memref<8x128xf32, #tpu.memory_space<vmem>>, vector<8x128xf32>
      tpu.vector_store %arg5[%c0_13, %c0_14], %14 {strides = array<i32>} : memref<8x128xf32, #tpu.memory_space<vmem>>, vector<8x128xf32>,
    } else {
    }
    return
  }
  func.func @transform_0(%arg0: i32, %arg1: i32, %arg2: i32) -> (i32, i32) {
    %c0_i32 = arith.constant 0 : i32
    return %arg0, %arg2 : i32, i32
  }
  func.func @transform_1(%arg0: i32, %arg1: i32, %arg2: i32) -> (i32, i32) {
    %c0_i32 = arith.constant 0 : i32
    return %arg2, %arg1 : i32, i32
  }
  func.func @transform_2(%arg0: i32, %arg1: i32, %arg2: i32) -> (i32, i32) {
    %c0_i32 = arith.constant 0 : i32
    return %arg0, %arg1 : i32, i32
  }
}

</mosaic_0001>

<bundles_post_ra>
// kernel: tpu_custom_call.1
= control target key start
LH: loop header
LB: loop body
LE: loop exit
PB: predicated region body
PF: predicated region fallthrough
CT: control target
= control target key end

     0   :  { %7 = vsyncpa [#allocation4], 0  ;;  %s363_s0 = inlined_call_operand.hbm [shape: bf16[8,128], index: 0, kind: input, shape index: {}]   ;;  %s364_s1 = inlined_call_operand.hbm [shape: bf16[128,128], index: 1, kind: input, shape index: {}]   ;;  %s365_s2 = inlined_call_operand.hbm [shape: f32[8,128], index: 2, kind: output, shape index: {}]  }
   0x1   :  { %8 = vsyncpa [#allocation7], 0 }
   0x2   :  { %9 = vsyncpa [#allocation5], 0  ;;  %s298_s9 = smov [#allocation3]   ;;  %s299_s11 = smov [#allocation6]  }
   0x3   :  { %s16_s10 = sshll.u32 %s298_s9, 4  ;;  %s25_s12 = sshll.u32 %s299_s11, 4  ;;  %s17_s10 = int_to_ptr.vmem [resolvable:$true] %s16_s10  ;;  %s320_s12 = int_to_ptr.vmem [resolvable:$true] %s25_s12 }
   0x4   :  { %s226_s15 = scalar_lea.hbm %s363_s0, 64 }
   0x5   :  { %p227_p0 = scmp.ne.s32.totalorder %s363_s0, %s226_s15  ;;  %p230_p1 = scmp.lt.u32.totalorder %s226_s15, %s363_s0 }
   0x7   :  { %p232_p2 = pnand %p230_p1, %p227_p0 }
   0x9   :  { %235 = shalt.err (!%p232_p2)
}
   0xa   :  { %s236_s20 = scalar_lea.vmem %s17_s10, 64  ;;  %p241_p4 = scmp.lt.s32.totalorder %s17_s10, %s17_s10 }
   0xb   :  { %p237_p3 = scmp.ne.s32.totalorder %s17_s10, %s236_s20  ;;  %p242_p5 = scmp.lt.s32.totalorder %s236_s20, %s236_s20 }
   0xd   :  { %p243_p6 = por %p242_p5, %p241_p4 }
   0xf   :  { %p244_p7 = pnand %p243_p6, %p237_p3 }
  0x11   :  { %247 = shalt.err (!%p244_p7)
}
  0x12   :  { %19 = dma.hbm_to_vmem [thread:$0]  %s363_s0, 64, %s17_s10, [#allocation4]  }
  0x13   :  { %s248_s25 = scalar_lea.hbm %s364_s1, 1024 }
  0x14   :  { %p249_p8 = scmp.ne.s32.totalorder %s364_s1, %s248_s25  ;;  %p252_p9 = scmp.lt.u32.totalorder %s248_s25, %s364_s1 }
  0x16   :  { %p254_p10 = pnand %p252_p9, %p249_p8 }
  0x18   :  { %257 = shalt.err (!%p254_p10)
}
  0x19   :  { %s258_s30 = scalar_lea.vmem %s320_s12, 1024  ;;  %p263_p12 = scmp.lt.s32.totalorder %s320_s12, %s320_s12 }
  0x1a   :  { %p259_p11 = scmp.ne.s32.totalorder %s320_s12, %s258_s30  ;;  %p264_p13 = scmp.lt.s32.totalorder %s258_s30, %s258_s30 }
  0x1c   :  { %p265_p0 = por %p264_p13, %p263_p12 }
  0x1e   :  { %p266_p1 = pnand %p265_p0, %p259_p11 }
  0x20   :  { %269 = shalt.err (!%p266_p1)
}
  0x21   :  { %s300_s0 = smov 64   ;;  %s301_s3 = smov 4  }
  0x22   :  { %31 = dma.hbm_to_vmem [thread:$0]  %s364_s1, 1024, %s320_s12, [#allocation7], %s300_s0, %s300_s0, %s301_s3  }
  0x23   :  { %292 = dma.done.wait [#allocation4], 64  }
  0x24   :  { %293 = vsyncadd [#allocation4], 4294967232 }
  0x25   :  { %294 = dma.done.wait [#allocation7], 1024  }
  0x26   :  { %295 = vsyncadd [#allocation7], 4294966272  ;;  %v302_v0 = vmov 0.0   ;;  %vm303_vm0 = vmmov 0   ;;  %v218_v1 = vld [vmem:[#allocation6] sm:$0xff]   ;;  %v219_v2 = vld [vmem:[#allocation6 + $0x8] sm:$0xff]  }
  0x27   :  { %191 = vmatprep.subr.bf16.mxu0 %v302_v0  ;;  %207 = vmatprep.mubr.msk.bf16.mxu0 %vm303_vm0, %v302_v0  ;;  %v220_v3 = vld [vmem:[#allocation6 + $0x10] sm:$0xff]   ;;  %v221_v4 = vld [vmem:[#allocation6 + $0x18] sm:$0xff]   ;;  %v222_v5 = vld [vmem:[#allocation6 + $0x20] sm:$0xff]   ;;  %s304_s1 = smov [#allocation8]  }
  0x28   :  { %192 = vmatpush3.bf16.msra.mxu0 %v218_v1  ;;  %v223_v6 = vld [vmem:[#allocation6 + $0x28] sm:$0xff]   ;;  %v224_v7 = vld [vmem:[#allocation6 + $0x30] sm:$0xff]   ;;  %v225_v8 = vld [vmem:[#allocation6 + $0x38] sm:$0xff]   ;;  %s164_s6 = sshll.u32 %s304_s1, 4  ;;  %s165_s6 = int_to_ptr.vmem [resolvable:$true] %s164_s6 }
  0x29   :  { %193 = vmatprep.subr.bf16.mxu0 %v302_v0  ;;  %v45_v9 = vld [vmem:[#allocation3] sm:$0xf]  ;;  %s270_s7 = scalar_lea.vmem %s165_s6, 128  ;;  %p275_p3 = scmp.lt.s32.totalorder %s165_s6, %s165_s6 }
  0x2a   :  { %p271_p2 = scmp.ne.s32.totalorder %s165_s6, %s270_s7  ;;  %p276_p4 = scmp.lt.s32.totalorder %s270_s7, %s270_s7 }
  0x2c   :  { %194 = vmatpush3.bf16.msra.mxu0 %v219_v2  ;;  %p277_p5 = por %p276_p4, %p275_p3 }
  0x2d   :  { %195 = vmatprep.subr.bf16.mxu0 %v302_v0 }
  0x2e   :  { %p278_p6 = pnand %p277_p5, %p271_p2 }
  0x30   :  { %196 = vmatpush3.bf16.msra.mxu0 %v220_v3 }
  0x31   :  { %197 = vmatprep.subr.bf16.mxu0 %v302_v0 }
  0x34   :  { %198 = vmatpush3.bf16.msra.mxu0 %v221_v4 }
  0x35   :  { %199 = vmatprep.subr.bf16.mxu0 %v302_v0 }
  0x38   :  { %200 = vmatpush3.bf16.msra.mxu0 %v222_v5 }
  0x39   :  { %201 = vmatprep.subr.bf16.mxu0 %v302_v0 }
  0x3c   :  { %202 = vmatpush3.bf16.msra.mxu0 %v223_v6 }
  0x3d   :  { %203 = vmatprep.subr.bf16.mxu0 %v302_v0 }
  0x40   :  { %204 = vmatpush3.bf16.msra.mxu0 %v224_v7 }
  0x41   :  { %205 = vmatprep.subr.bf16.mxu0 %v302_v0 }
  0x44   :  { %206 = vmatpush3.bf16.msra.mxu0 %v225_v8 }
  0x47   :  { %208 = vmatmul.mubr.bf16.vlgmr.msra.gmra.mrb[0].mxu0 %v45_v9 }
 0x11a   :  { %v144_v10 = vpop.f32.mrb[0].mxu0 }
 0x11b   :  { %v156_v11 = vmul.f32 1.125, %v144_v10  ;;  %v209_v12 = vpop.f32.mrb[1].mxu0 }
 0x11c   :  { %v147_v13 = vpop.f32.mrb[2].mxu0 }
 0x11d   :  { %157 = vst [vmem:[#allocation8] sm:$0xff] %v156_v11  ;;  %v210_v14 = vpop.f32.mrb[3].mxu0 }
 0x11e   :  { %281 = shalt.err (!%p278_p6)
}
 0x11f   :  { %s282_s10 = scalar_lea.hbm %s365_s2, 128 }
 0x120   :  { %p283_p7 = scmp.ne.s32.totalorder %s365_s2, %s282_s10  ;;  %p286_p8 = scmp.lt.u32.totalorder %s282_s10, %s365_s2 }
 0x122   :  { %p288_p9 = pnand %p286_p8, %p283_p7 }
 0x124   :  { %291 = shalt.err (!%p288_p9)
}
 0x125   :  { %167 = dma.vmem_to_hbm [thread:$0]  %s165_s6, 128, %s365_s2, [#allocation5]  }
 0x126   :  { %296 = dma.done.wait [#allocation5], 128  }
 0x127   :  { %297 = vsyncadd [#allocation5], 4294967168 }
 0x128   :  { %171 = vsyncpa [#allocation4], 1 }
 0x129   :  { %172 = vsyncpa [#allocation7], 1 }
 0x12a   :  { %173 = vsyncpa [#allocation5], 1 }

</bundles_post_ra>
